<compile_context>
chip_gen: v7x
topology: tpu7x:2x2x1
jax: 0.10.0
libtpu: 0.0.40
codegen_flags: <defaults>
</compile_context>

<pallas_src>
import jax
import jax.numpy as jnp
from jax.experimental import pallas as pl
from jax.experimental.pallas import tpu as pltpu

_LANE = 128
_ROW_GRANULE = 16                        # sublane granule covering f32 (8) and bf16 (16)
_GRANULE_ELEMS = _ROW_GRANULE * _LANE    # minimal pad quantum = 2048 elements
_TARGET_BLOCK_BYTES = 1 << 20            # ~1 MiB per stream per grid step
_MAX_BLOCK_ROWS = 4096                   # keeps 4-stream double-buffered VMEM <= 16 MiB


def _softplus(x):
    # numerically stable log(1 + exp(x)) (matches torch.nn.Softplus)
    return jnp.logaddexp(x, 0.0)


def _get_loss_terms(name):
    """JAX equivalents of get_loss_func(name). m = model_logit, o = old_model_logit."""
    if name == 'JS':
        p = lambda m, o: -1.0 * _softplus(o - m)
        q = lambda m, o: -1.0 * _softplus(m - o)
    elif name == 'KL':
        p = lambda m, o: m - o
        q = lambda m, o: -1.0 * jnp.exp(m - o)
    elif name == 'RKL':
        p = lambda m, o: -1.0 * jnp.exp(o - m)
        q = lambda m, o: o - m
    elif name == 'PX2':
        p = lambda m, o: 2.0 * jnp.exp(m - o)
        q = lambda m, o: jnp.exp(2.0 * (m - o))
    elif name == 'SH':
        p = lambda m, o: -1.0 * jnp.exp(0.5 * (o - m))
        q = lambda m, o: -1.0 * jnp.exp(0.5 * (m - o))
    elif name == 'NX2':
        p = lambda m, o: -1.0 * jnp.exp(2.0 * (o - m))
        q = lambda m, o: 2.0 * jnp.exp(o - m)
    elif name == 'Jeff':
        p = lambda m, o: m - o - jnp.exp(o - m)
        q = lambda m, o: -(m - o) - jnp.exp(m - o)
    else:
        raise ValueError(f"unknown loss type: {name}")
    return p, q


def _cdiv(a, b):
    return -(-a // b)


def _round_up(a, m):
    return _cdiv(a, m) * m


def dgsan_loss(p_new, p_old, q_new, q_old, loss_type='JS', block_rows=None):
    assert p_new.shape == p_old.shape
    assert q_new.shape == q_old.shape
    assert p_new.ndim == 1 and q_new.ndim == 1

    p_fn, q_fn = _get_loss_terms(loss_type)
    n_p = p_new.shape[0]
    n_q = q_new.shape[0]
    if n_p == 0 or n_q == 0:
        # torch .mean() of an empty tensor is NaN; keep that semantics.
        return jnp.float32(jnp.nan)

    def prep(x):
        dt = jnp.bfloat16 if x.dtype == jnp.bfloat16 else jnp.float32
        x = x.astype(dt)
        pad = (-x.shape[0]) % _GRANULE_ELEMS
        if pad:
            # TODO(synk): this minimal (<2048 elem) pad still copies the array once
            # for unaligned N; a fully copy-free path would stream the raw 1-D array.
            x = jnp.pad(x, (0, pad))
        return x.reshape(-1, _LANE)

    pn, po = prep(p_new), prep(p_old)
    qn, qo = prep(q_new), prep(q_old)
    rows_p, rows_q = pn.shape[0], qn.shape[0]

    def pick_tr(rows, itemsize):
        if block_rows is None:
            t = _TARGET_BLOCK_BYTES // (_LANE * itemsize)
        else:
            t = block_rows
        t = max(_ROW_GRANULE, min(_MAX_BLOCK_ROWS, _round_up(t, _ROW_GRANULE)))
        return min(t, rows)          # rows is a multiple of 16, so tr stays a multiple of 16

    tr_p = pick_tr(rows_p, max(pn.dtype.itemsize, po.dtype.itemsize))
    tr_q = pick_tr(rows_q, max(qn.dtype.itemsize, qo.dtype.itemsize))
    nblocks_p = _cdiv(rows_p, tr_p)
    nblocks_q = _cdiv(rows_q, tr_q)

    total_blocks = max(nblocks_p, nblocks_q)
    n_shards = 2 if total_blocks >= 2 else 1      # one shard per TensorCore on v7x
    nb = _cdiv(total_blocks, n_shards)            # row-blocks per shard
    grid = (n_shards, nb)

    def kernel(pn_ref, po_ref, qn_ref, qo_ref, out_ref, acc_p, acc_q):
        c = pl.program_id(0)
        j = pl.program_id(1)

        @pl.when(j == 0)
        def _init():
            acc_p[...] = jnp.zeros_like(acc_p)
            acc_q[...] = jnp.zeros_like(acc_q)

        def accum(acc, new_ref, old_ref, term_fn, n, tr, nblocks):
            chunk = tr * _LANE
            # NOTE: int32 flat index; fine for n < 2**31 elements.
            base = (c * nb + j) * chunk

            def term():
                return term_fn(new_ref[...].astype(jnp.float32),
                               old_ref[...].astype(jnp.float32))

            def add(x):
                # vreg-wise (VALU-only) partial reduce into the (8,128) accumulator.
                acc[...] += x.reshape(tr // 8, 8, _LANE).sum(axis=0)

            aligned = (n % chunk) == 0
            covers_grid = nblocks == n_shards * nb
            if aligned and covers_grid:
                add(term())                       # unmasked steady state, no gating
                return

            @pl.when(base + chunk <= n)           # fully valid block
            def _full():
                add(term())

            if not aligned:
                @pl.when((base < n) & (base + chunk > n))   # ragged last block only
                def _partial():
                    row = jax.lax.broadcasted_iota(jnp.int32, (tr, _LANE), 0)
                    col = jax.lax.broadcasted_iota(jnp.int32, (tr, _LANE), 1)
                    idx = base + row * _LANE + col
                    add(jnp.where(idx < n, term(), 0.0))
            # blocks with base >= n (stream shorter than the grid) contribute nothing

        accum(acc_p, pn_ref, po_ref, p_fn, n_p, tr_p, nblocks_p)
        accum(acc_q, qn_ref, qo_ref, q_fn, n_q, tr_q, nblocks_q)

        @pl.when(j == nb - 1)
        def _finalize():
            # Fold -1/N into the single final lane-dense store; the cross-lane
            # reduction happens once, in the wrapper.
            out_ref[0, :, :] = (acc_p[...] * jnp.float32(-1.0 / n_p)
                                + acc_q[...] * jnp.float32(-1.0 / n_q))

    def stream_spec(tr, nblocks):
        last = nblocks - 1
        # Clamp the block index so shorter streams keep their DMAs in-bounds on
        # grid steps past their end (those steps are masked out in-kernel).
        return pl.BlockSpec((tr, _LANE),
                            lambda i, j: (jnp.minimum(i * nb + j, last), 0))

    partials = pl.pallas_call(
        kernel,
        out_shape=jax.ShapeDtypeStruct((n_shards, 8, _LANE), jnp.float32),
        grid=grid,
        in_specs=[
            stream_spec(tr_p, nblocks_p),   # p_new
            stream_spec(tr_p, nblocks_p),   # p_old
            stream_spec(tr_q, nblocks_q),   # q_new
            stream_spec(tr_q, nblocks_q),   # q_old
        ],
        out_specs=pl.BlockSpec((1, 8, _LANE), lambda i, j: (i, 0, 0)),
        scratch_shapes=[pltpu.VMEM((8, _LANE), jnp.float32),
                        pltpu.VMEM((8, _LANE), jnp.float32)],
        compiler_params=pltpu.CompilerParams(
            dimension_semantics=("parallel", "arbitrary"),
            vmem_limit_bytes=32 * 1024 * 1024,
        ),
    )(pn, po, qn, qo)

    # Tiny XLA reduction over (n_shards, 8, 128) scaled partial sums.
    return jnp.sum(partials)


def _reference_loss(p_new, p_old, q_new, q_old, loss_type):
    p_fn, q_fn = _get_loss_terms(loss_type)
    pn, po = p_new.astype(jnp.float32), p_old.astype(jnp.float32)
    qn, qo = q_new.astype(jnp.float32), q_old.astype(jnp.float32)
    return -jnp.mean(p_fn(pn, po)) + -jnp.mean(q_fn(qn, qo))


if __name__ == "__main__":
    key = jax.random.PRNGKey(0)

    def make(k, n, dtype=jnp.float32):
        return (0.5 * jax.random.normal(k, (n,), jnp.float32) - 1.0).astype(dtype)

    # Test 1: small seq-like shapes, single block, JS divergence.
    k1, k2, k3, k4, key = jax.random.split(key, 5)
    p_new, p_old = make(k1, 8), make(k2, 8)
    q_new, q_old = make(k3, 12), make(k4, 12)
    out = jax.block_until_ready(dgsan_loss(p_new, p_old, q_new, q_old, 'JS'))
    ref = _reference_loss(p_new, p_old, q_new, q_old, 'JS')
    assert jnp.allclose(out, ref, rtol=1e-5, atol=1e-5), (out, ref)

    # Test 2: larger, unaligned, *different* lengths with a small block to exercise
    # the multi-step grid, shard axis, clamped index maps and tail masking (KL).
    k1, k2, k3, k4, key = jax.random.split(key, 5)
    p_new, p_old = make(k1, 5000), make(k2, 5000)
    q_new, q_old = make(k3, 3777), make(k4, 3777)
    out = jax.block_until_ready(
        dgsan_loss(p_new, p_old, q_new, q_old, 'KL', block_rows=16))
    ref = _reference_loss(p_new, p_old, q_new, q_old, 'KL')
    assert jnp.allclose(out, ref, rtol=1e-5, atol=1e-5), (out, ref)

    # Test 3: bf16 inputs stay bf16 in HBM and are upcast in-kernel (Jeffreys).
    k1, k2, k3, k4, key = jax.random.split(key, 5)
    p_new, p_old = make(k1, 8, jnp.bfloat16), make(k2, 8, jnp.bfloat16)
    q_new, q_old = make(k3, 8, jnp.bfloat16), make(k4, 8, jnp.bfloat16)
    out = jax.block_until_ready(dgsan_loss(p_new, p_old, q_new, q_old, 'Jeff'))
    ref = _reference_loss(p_new, p_old, q_new, q_old, 'Jeff')
    assert jnp.allclose(out, ref, rtol=1e-4, atol=1e-4), (out, ref)

    # Test 4: tile-aligned lengths hit the unmasked fast path across 2 shards (SH).
    k1, k2, k3, k4, key = jax.random.split(key, 5)
    p_new, p_old = make(k1, 4096), make(k2, 4096)
    q_new, q_old = make(k3, 4096), make(k4, 4096)
    out = jax.block_until_ready(
        dgsan_loss(p_new, p_old, q_new, q_old, 'SH', block_rows=16))
    ref = _reference_loss(p_new, p_old, q_new, q_old, 'SH')
    assert jnp.allclose(out, ref, rtol=1e-5, atol=1e-5), (out, ref)

    print("KERNEL_OK")
</pallas_src>

<mosaic_0001>
module attributes {stable_mosaic.version = 11 : i64} {
  func.func @kernel(%arg0: i32, %arg1: i32, %arg2: memref<16x128xf32, #tpu.memory_space<vmem>>, %arg3: memref<16x128xf32, #tpu.memory_space<vmem>>, %arg4: memref<16x128xf32, #tpu.memory_space<vmem>>, %arg5: memref<16x128xf32, #tpu.memory_space<vmem>>, %arg6: memref<1x8x128xf32, #tpu.memory_space<vmem>>, %arg7: memref<8x128xf32, #tpu.memory_space<vmem>>, %arg8: memref<8x128xf32, #tpu.memory_space<vmem>>) attributes {dimension_semantics = [#tpu.dimension_semantics<parallel>, #tpu.dimension_semantics<arbitrary>], iteration_bounds = array<i64: 1, 1>, scalar_prefetch = 0 : i64, scratch_operands = 2 : i64, tpu.core_type = #tpu.core_type<tc>, window_params = [{transform_indices = @transform_0, window_bounds = array<i64: 16, 128>}, {transform_indices = @transform_1, window_bounds = array<i64: 16, 128>}, {transform_indices = @transform_2, window_bounds = array<i64: 16, 128>}, {transform_indices = @transform_3, window_bounds = array<i64: 16, 128>}, {transform_indices = @transform_4, window_bounds = array<i64: 1, 8, 128>}]} {
    %c0_i32 = arith.constant 0 : i32
    %0 = arith.cmpi eq, %arg1, %c0_i32 : i32
    %1 = arith.extui %0 : i1 to i32
    %c0_i32_0 = arith.constant 0 : i32
    %2 = arith.cmpi ne, %1, %c0_i32_0 : i32
    scf.if %2 {
      %cst = arith.constant 0.000000e+00 : f32
      %32 = vector.broadcast %cst : f32 to vector<8x128xf32>
      %c0 = arith.constant 0 : index
      %c0_17 = arith.constant 0 : index
      %33 = vector.load %arg7[%c0, %c0_17] : memref<8x128xf32, #tpu.memory_space<vmem>>, vector<8x128xf32>
      tpu.vector_store %arg7[%c0, %c0_17], %32 {strides = array<i32>} : memref<8x128xf32, #tpu.memory_space<vmem>>, vector<8x128xf32>,
      %cst_18 = arith.constant 0.000000e+00 : f32
      %34 = vector.broadcast %cst_18 : f32 to vector<8x128xf32>
      %c0_19 = arith.constant 0 : index
      %c0_20 = arith.constant 0 : index
      %35 = vector.load %arg8[%c0_19, %c0_20] : memref<8x128xf32, #tpu.memory_space<vmem>>, vector<8x128xf32>
      tpu.vector_store %arg8[%c0_19, %c0_20], %34 {strides = array<i32>} : memref<8x128xf32, #tpu.memory_space<vmem>>, vector<8x128xf32>,
    } else {
    }
    %c1_i32 = arith.constant 1 : i32
    %3 = arith.muli %arg0, %c1_i32 : i32
    %4 = arith.addi %3, %arg1 : i32
    %c2048_i32 = arith.constant 2048 : i32
    %5 = arith.muli %4, %c2048_i32 : i32
    %c2048_i32_1 = arith.constant 2048 : i32
    %6 = arith.addi %5, %c2048_i32_1 : i32
    %c8_i32 = arith.constant 8 : i32
    %7 = arith.cmpi sle, %6, %c8_i32 : i32
    %8 = arith.extui %7 : i1 to i32
    %c0_i32_2 = arith.constant 0 : i32
    %9 = arith.cmpi ne, %8, %c0_i32_2 : i32
    scf.if %9 {
      %c0 = arith.constant 0 : index
      %c0_17 = arith.constant 0 : index
      %32 = vector.load %arg2[%c0, %c0_17] : memref<16x128xf32, #tpu.memory_space<vmem>>, vector<16x128xf32>
      %c0_18 = arith.constant 0 : index
      %c0_19 = arith.constant 0 : index
      %33 = vector.load %arg3[%c0_18, %c0_19] : memref<16x128xf32, #tpu.memory_space<vmem>>, vector<16x128xf32>
      %34 = arith.subf %33, %32 : vector<16x128xf32>
      %cst = arith.constant 0.000000e+00 : f32
      %35 = vector.broadcast %cst : f32 to vector<16x128xf32>
      %36 = arith.maximumf %34, %35 : vector<16x128xf32>
      %37 = vector.broadcast %cst : f32 to vector<16x128xf32>
      %38 = arith.subf %34, %37 : vector<16x128xf32>
      %39 = arith.cmpf one, %38, %38 : vector<16x128xf32>
      %40 = vector.broadcast %cst : f32 to vector<16x128xf32>
      %41 = arith.addf %34, %40 : vector<16x128xf32>
      %42 = math.absf %38 : vector<16x128xf32>
      %cst_20 = arith.constant 0.000000e+00 : f32
      %43 = vector.broadcast %cst_20 : f32 to vector<16x128xf32>
      %44 = arith.subf %43, %42 : vector<16x128xf32>
      %45 = math.exp %44 : vector<16x128xf32>
      %46 = math.log1p %45 : vector<16x128xf32>
      %47 = arith.addf %36, %46 : vector<16x128xf32>
      %48 = arith.select %39, %41, %47 : vector<16x128xi1>, vector<16x128xf32>
      %cst_21 = arith.constant -1.000000e+00 : f32
      %49 = vector.broadcast %cst_21 : f32 to vector<16x128xf32>
      %50 = arith.mulf %49, %48 : vector<16x128xf32>
      %c0_22 = arith.constant 0 : index
      %c0_23 = arith.constant 0 : index
      %51 = vector.load %arg7[%c0_22, %c0_23] : memref<8x128xf32, #tpu.memory_space<vmem>>, vector<8x128xf32>
      %52 = vector.shape_cast %50 : vector<16x128xf32> to vector<2x8x128xf32>
      %cst_24 = arith.constant dense<0.000000e+00> : vector<8x128xf32>
      %53 = vector.multi_reduction <add>, %52, %cst_24 [0] : vector<2x8x128xf32> to vector<8x128xf32>
      %54 = arith.addf %51, %53 : vector<8x128xf32>
      %c0_25 = arith.constant 0 : index
      %c0_26 = arith.constant 0 : index
      %55 = vector.load %arg7[%c0_25, %c0_26] : memref<8x128xf32, #tpu.memory_space<vmem>>, vector<8x128xf32>
      tpu.vector_store %arg7[%c0_25, %c0_26], %54 {strides = array<i32>} : memref<8x128xf32, #tpu.memory_space<vmem>>, vector<8x128xf32>,
    } else {
    }
    %c8_i32_3 = arith.constant 8 : i32
    %10 = arith.cmpi slt, %5, %c8_i32_3 : i32
    %c2048_i32_4 = arith.constant 2048 : i32
    %11 = arith.addi %5, %c2048_i32_4 : i32
    %c8_i32_5 = arith.constant 8 : i32
    %12 = arith.cmpi sgt, %11, %c8_i32_5 : i32
    %13 = arith.andi %10, %12 : i1
    %14 = arith.extui %13 : i1 to i32
    %c0_i32_6 = arith.constant 0 : i32
    %15 = arith.cmpi ne, %14, %c0_i32_6 : i32
    scf.if %15 {
      %32 = tpu.iota {dimensions = array<i32: 0>} : vector<16x128xi32>
      %33 = tpu.iota {dimensions = array<i32: 1>} : vector<16x128xi32>
      %c128_i32 = arith.constant 128 : i32
      %34 = vector.broadcast %c128_i32 : i32 to vector<16x128xi32>
      %35 = arith.muli %32, %34 : vector<16x128xi32>
      %36 = vector.broadcast %5 : i32 to vector<16x128xi32>
      %37 = arith.addi %36, %35 : vector<16x128xi32>
      %38 = arith.addi %37, %33 : vector<16x128xi32>
      %c8_i32_17 = arith.constant 8 : i32
      %39 = vector.broadcast %c8_i32_17 : i32 to vector<16x128xi32>
      %40 = arith.cmpi slt, %38, %39 : vector<16x128xi32>
      %c0 = arith.constant 0 : index
      %c0_18 = arith.constant 0 : index
      %41 = vector.load %arg2[%c0, %c0_18] : memref<16x128xf32, #tpu.memory_space<vmem>>, vector<16x128xf32>
      %c0_19 = arith.constant 0 : index
      %c0_20 = arith.constant 0 : index
      %42 = vector.load %arg3[%c0_19, %c0_20] : memref<16x128xf32, #tpu.memory_space<vmem>>, vector<16x128xf32>
      %43 = arith.subf %42, %41 : vector<16x128xf32>
      %cst = arith.constant 0.000000e+00 : f32
      %44 = vector.broadcast %cst : f32 to vector<16x128xf32>
      %45 = arith.maximumf %43, %44 : vector<16x128xf32>
      %46 = vector.broadcast %cst : f32 to vector<16x128xf32>
      %47 = arith.subf %43, %46 : vector<16x128xf32>
      %48 = arith.cmpf one, %47, %47 : vector<16x128xf32>
      %49 = vector.broadcast %cst : f32 to vector<16x128xf32>
      %50 = arith.addf %43, %49 : vector<16x128xf32>
      %51 = math.absf %47 : vector<16x128xf32>
      %cst_21 = arith.constant 0.000000e+00 : f32
      %52 = vector.broadcast %cst_21 : f32 to vector<16x128xf32>
      %53 = arith.subf %52, %51 : vector<16x128xf32>
      %54 = math.exp %53 : vector<16x128xf32>
      %55 = math.log1p %54 : vector<16x128xf32>
      %56 = arith.addf %45, %55 : vector<16x128xf32>
      %57 = arith.select %48, %50, %56 : vector<16x128xi1>, vector<16x128xf32>
      %cst_22 = arith.constant -1.000000e+00 : f32
      %58 = vector.broadcast %cst_22 : f32 to vector<16x128xf32>
      %59 = arith.mulf %58, %57 : vector<16x128xf32>
      %cst_23 = arith.constant 0.000000e+00 : f32
      %60 = vector.broadcast %cst_23 : f32 to vector<16x128xf32>
      %61 = arith.select %40, %59, %60 : vector<16x128xi1>, vector<16x128xf32>
      %c0_24 = arith.constant 0 : index
      %c0_25 = arith.constant 0 : index
      %62 = vector.load %arg7[%c0_24, %c0_25] : memref<8x128xf32, #tpu.memory_space<vmem>>, vector<8x128xf32>
      %63 = vector.shape_cast %61 : vector<16x128xf32> to vector<2x8x128xf32>
      %cst_26 = arith.constant dense<0.000000e+00> : vector<8x128xf32>
      %64 = vector.multi_reduction <add>, %63, %cst_26 [0] : vector<2x8x128xf32> to vector<8x128xf32>
      %65 = arith.addf %62, %64 : vector<8x128xf32>
      %c0_27 = arith.constant 0 : index
      %c0_28 = arith.constant 0 : index
      %66 = vector.load %arg7[%c0_27, %c0_28] : memref<8x128xf32, #tpu.memory_space<vmem>>, vector<8x128xf32>
      tpu.vector_store %arg7[%c0_27, %c0_28], %65 {strides = array<i32>} : memref<8x128xf32, #tpu.memory_space<vmem>>, vector<8x128xf32>,
    } else {
    }
    %c1_i32_7 = arith.constant 1 : i32
    %16 = arith.muli %arg0, %c1_i32_7 : i32
    %17 = arith.addi %16, %arg1 : i32
    %c2048_i32_8 = arith.constant 2048 : i32
    %18 = arith.muli %17, %c2048_i32_8 : i32
    %c2048_i32_9 = arith.constant 2048 : i32
    %19 = arith.addi %18, %c2048_i32_9 : i32
    %c12_i32 = arith.constant 12 : i32
    %20 = arith.cmpi sle, %19, %c12_i32 : i32
    %21 = arith.extui %20 : i1 to i32
    %c0_i32_10 = arith.constant 0 : i32
    %22 = arith.cmpi ne, %21, %c0_i32_10 : i32
    scf.if %22 {
      %c0 = arith.constant 0 : index
      %c0_17 = arith.constant 0 : index
      %32 = vector.load %arg4[%c0, %c0_17] : memref<16x128xf32, #tpu.memory_space<vmem>>, vector<16x128xf32>
      %c0_18 = arith.constant 0 : index
      %c0_19 = arith.constant 0 : index
      %33 = vector.load %arg5[%c0_18, %c0_19] : memref<16x128xf32, #tpu.memory_space<vmem>>, vector<16x128xf32>
      %34 = arith.subf %32, %33 : vector<16x128xf32>
      %cst = arith.constant 0.000000e+00 : f32
      %35 = vector.broadcast %cst : f32 to vector<16x128xf32>
      %36 = arith.maximumf %34, %35 : vector<16x128xf32>
      %37 = vector.broadcast %cst : f32 to vector<16x128xf32>
      %38 = arith.subf %34, %37 : vector<16x128xf32>
      %39 = arith.cmpf one, %38, %38 : vector<16x128xf32>
      %40 = vector.broadcast %cst : f32 to vector<16x128xf32>
      %41 = arith.addf %34, %40 : vector<16x128xf32>
      %42 = math.absf %38 : vector<16x128xf32>
      %cst_20 = arith.constant 0.000000e+00 : f32
      %43 = vector.broadcast %cst_20 : f32 to vector<16x128xf32>
      %44 = arith.subf %43, %42 : vector<16x128xf32>
      %45 = math.exp %44 : vector<16x128xf32>
      %46 = math.log1p %45 : vector<16x128xf32>
      %47 = arith.addf %36, %46 : vector<16x128xf32>
      %48 = arith.select %39, %41, %47 : vector<16x128xi1>, vector<16x128xf32>
      %cst_21 = arith.constant -1.000000e+00 : f32
      %49 = vector.broadcast %cst_21 : f32 to vector<16x128xf32>
      %50 = arith.mulf %49, %48 : vector<16x128xf32>
      %c0_22 = arith.constant 0 : index
      %c0_23 = arith.constant 0 : index
      %51 = vector.load %arg8[%c0_22, %c0_23] : memref<8x128xf32, #tpu.memory_space<vmem>>, vector<8x128xf32>
      %52 = vector.shape_cast %50 : vector<16x128xf32> to vector<2x8x128xf32>
      %cst_24 = arith.constant dense<0.000000e+00> : vector<8x128xf32>
      %53 = vector.multi_reduction <add>, %52, %cst_24 [0] : vector<2x8x128xf32> to vector<8x128xf32>
      %54 = arith.addf %51, %53 : vector<8x128xf32>
      %c0_25 = arith.constant 0 : index
      %c0_26 = arith.constant 0 : index
      %55 = vector.load %arg8[%c0_25, %c0_26] : memref<8x128xf32, #tpu.memory_space<vmem>>, vector<8x128xf32>
      tpu.vector_store %arg8[%c0_25, %c0_26], %54 {strides = array<i32>} : memref<8x128xf32, #tpu.memory_space<vmem>>, vector<8x128xf32>,
    } else {
    }
    %c12_i32_11 = arith.constant 12 : i32
    %23 = arith.cmpi slt, %18, %c12_i32_11 : i32
    %c2048_i32_12 = arith.constant 2048 : i32
    %24 = arith.addi %18, %c2048_i32_12 : i32
    %c12_i32_13 = arith.constant 12 : i32
    %25 = arith.cmpi sgt, %24, %c12_i32_13 : i32
    %26 = arith.andi %23, %25 : i1
    %27 = arith.extui %26 : i1 to i32
    %c0_i32_14 = arith.constant 0 : i32
    %28 = arith.cmpi ne, %27, %c0_i32_14 : i32
    scf.if %28 {
      %32 = tpu.iota {dimensions = array<i32: 0>} : vector<16x128xi32>
      %33 = tpu.iota {dimensions = array<i32: 1>} : vector<16x128xi32>
      %c128_i32 = arith.constant 128 : i32
      %34 = vector.broadcast %c128_i32 : i32 to vector<16x128xi32>
      %35 = arith.muli %32, %34 : vector<16x128xi32>
      %36 = vector.broadcast %18 : i32 to vector<16x128xi32>
      %37 = arith.addi %36, %35 : vector<16x128xi32>
      %38 = arith.addi %37, %33 : vector<16x128xi32>
      %c12_i32_17 = arith.constant 12 : i32
      %39 = vector.broadcast %c12_i32_17 : i32 to vector<16x128xi32>
      %40 = arith.cmpi slt, %38, %39 : vector<16x128xi32>
      %c0 = arith.constant 0 : index
      %c0_18 = arith.constant 0 : index
      %41 = vector.load %arg4[%c0, %c0_18] : memref<16x128xf32, #tpu.memory_space<vmem>>, vector<16x128xf32>
      %c0_19 = arith.constant 0 : index
      %c0_20 = arith.constant 0 : index
      %42 = vector.load %arg5[%c0_19, %c0_20] : memref<16x128xf32, #tpu.memory_space<vmem>>, vector<16x128xf32>
      %43 = arith.subf %41, %42 : vector<16x128xf32>
      %cst = arith.constant 0.000000e+00 : f32
      %44 = vector.broadcast %cst : f32 to vector<16x128xf32>
      %45 = arith.maximumf %43, %44 : vector<16x128xf32>
      %46 = vector.broadcast %cst : f32 to vector<16x128xf32>
      %47 = arith.subf %43, %46 : vector<16x128xf32>
      %48 = arith.cmpf one, %47, %47 : vector<16x128xf32>
      %49 = vector.broadcast %cst : f32 to vector<16x128xf32>
      %50 = arith.addf %43, %49 : vector<16x128xf32>
      %51 = math.absf %47 : vector<16x128xf32>
      %cst_21 = arith.constant 0.000000e+00 : f32
      %52 = vector.broadcast %cst_21 : f32 to vector<16x128xf32>
      %53 = arith.subf %52, %51 : vector<16x128xf32>
      %54 = math.exp %53 : vector<16x128xf32>
      %55 = math.log1p %54 : vector<16x128xf32>
      %56 = arith.addf %45, %55 : vector<16x128xf32>
      %57 = arith.select %48, %50, %56 : vector<16x128xi1>, vector<16x128xf32>
      %cst_22 = arith.constant -1.000000e+00 : f32
      %58 = vector.broadcast %cst_22 : f32 to vector<16x128xf32>
      %59 = arith.mulf %58, %57 : vector<16x128xf32>
      %cst_23 = arith.constant 0.000000e+00 : f32
      %60 = vector.broadcast %cst_23 : f32 to vector<16x128xf32>
      %61 = arith.select %40, %59, %60 : vector<16x128xi1>, vector<16x128xf32>
      %c0_24 = arith.constant 0 : index
      %c0_25 = arith.constant 0 : index
      %62 = vector.load %arg8[%c0_24, %c0_25] : memref<8x128xf32, #tpu.memory_space<vmem>>, vector<8x128xf32>
      %63 = vector.shape_cast %61 : vector<16x128xf32> to vector<2x8x128xf32>
      %cst_26 = arith.constant dense<0.000000e+00> : vector<8x128xf32>
      %64 = vector.multi_reduction <add>, %63, %cst_26 [0] : vector<2x8x128xf32> to vector<8x128xf32>
      %65 = arith.addf %62, %64 : vector<8x128xf32>
      %c0_27 = arith.constant 0 : index
      %c0_28 = arith.constant 0 : index
      %66 = vector.load %arg8[%c0_27, %c0_28] : memref<8x128xf32, #tpu.memory_space<vmem>>, vector<8x128xf32>
      tpu.vector_store %arg8[%c0_27, %c0_28], %65 {strides = array<i32>} : memref<8x128xf32, #tpu.memory_space<vmem>>, vector<8x128xf32>,
    } else {
    }
    %c0_i32_15 = arith.constant 0 : i32
    %29 = arith.cmpi eq, %arg1, %c0_i32_15 : i32
    %30 = arith.extui %29 : i1 to i32
    %c0_i32_16 = arith.constant 0 : i32
    %31 = arith.cmpi ne, %30, %c0_i32_16 : i32
    scf.if %31 {
      %c0 = arith.constant 0 : index
      %c0_17 = arith.constant 0 : index
      %32 = vector.load %arg7[%c0, %c0_17] : memref<8x128xf32, #tpu.memory_space<vmem>>, vector<8x128xf32>
      %cst = arith.constant -1.250000e-01 : f32
      %33 = vector.broadcast %cst : f32 to vector<8x128xf32>
      %34 = arith.mulf %32, %33 : vector<8x128xf32>
      %c0_18 = arith.constant 0 : index
      %c0_19 = arith.constant 0 : index
      %35 = vector.load %arg8[%c0_18, %c0_19] : memref<8x128xf32, #tpu.memory_space<vmem>>, vector<8x128xf32>
      %cst_20 = arith.constant -0.0833333358 : f32
      %36 = vector.broadcast %cst_20 : f32 to vector<8x128xf32>
      %37 = arith.mulf %35, %36 : vector<8x128xf32>
      %38 = arith.addf %34, %37 : vector<8x128xf32>
      %c0_21 = arith.constant 0 : index
      %c0_22 = arith.constant 0 : index
      %c0_23 = arith.constant 0 : index
      %39 = vector.load %arg6[%c0_21, %c0_22, %c0_23] : memref<1x8x128xf32, #tpu.memory_space<vmem>>, vector<1x8x128xf32>
      %40 = vector.shape_cast %39 : vector<1x8x128xf32> to vector<8x128xf32>
      %41 = vector.shape_cast %38 : vector<8x128xf32> to vector<1x8x128xf32>
      tpu.vector_store %arg6[%c0_21, %c0_22, %c0_23], %41 {strides = array<i32>} : memref<1x8x128xf32, #tpu.memory_space<vmem>>, vector<1x8x128xf32>,
    } else {
    }
    return
  }
  func.func @transform_0(%arg0: i32, %arg1: i32) -> (i32, i32) {
    %c1_i32 = arith.constant 1 : i32
    %0 = arith.muli %arg0, %c1_i32 : i32
    %1 = arith.addi %0, %arg1 : i32
    %c0_i32 = arith.constant 0 : i32
    %2 = arith.minsi %1, %c0_i32 : i32
    %c0_i32_0 = arith.constant 0 : i32
    %c0_i32_1 = arith.constant 0 : i32
    return %2, %c0_i32_0 : i32, i32
  }
  func.func @transform_1(%arg0: i32, %arg1: i32) -> (i32, i32) {
    %c1_i32 = arith.constant 1 : i32
    %0 = arith.muli %arg0, %c1_i32 : i32
    %1 = arith.addi %0, %arg1 : i32
    %c0_i32 = arith.constant 0 : i32
    %2 = arith.minsi %1, %c0_i32 : i32
    %c0_i32_0 = arith.constant 0 : i32
    %c0_i32_1 = arith.constant 0 : i32
    return %2, %c0_i32_0 : i32, i32
  }
  func.func @transform_2(%arg0: i32, %arg1: i32) -> (i32, i32) {
    %c1_i32 = arith.constant 1 : i32
    %0 = arith.muli %arg0, %c1_i32 : i32
    %1 = arith.addi %0, %arg1 : i32
    %c0_i32 = arith.constant 0 : i32
    %2 = arith.minsi %1, %c0_i32 : i32
    %c0_i32_0 = arith.constant 0 : i32
    %c0_i32_1 = arith.constant 0 : i32
    return %2, %c0_i32_0 : i32, i32
  }
  func.func @transform_3(%arg0: i32, %arg1: i32) -> (i32, i32) {
    %c1_i32 = arith.constant 1 : i32
    %0 = arith.muli %arg0, %c1_i32 : i32
    %1 = arith.addi %0, %arg1 : i32
    %c0_i32 = arith.constant 0 : i32
    %2 = arith.minsi %1, %c0_i32 : i32
    %c0_i32_0 = arith.constant 0 : i32
    %c0_i32_1 = arith.constant 0 : i32
    return %2, %c0_i32_0 : i32, i32
  }
  func.func @transform_4(%arg0: i32, %arg1: i32) -> (i32, i32, i32) {
    %c0_i32 = arith.constant 0 : i32
    %c0_i32_0 = arith.constant 0 : i32
    %c0_i32_1 = arith.constant 0 : i32
    return %arg0, %c0_i32, %c0_i32_0 : i32, i32, i32
  }
}

</mosaic_0001>

<bundles_post_ra>
// kernel: tpu_custom_call.1
= control target key start
LH: loop header
LB: loop body
LE: loop exit
PB: predicated region body
PF: predicated region fallthrough
CT: control target
= control target key end

     0   :  { %9 = vsyncpa [#allocation5], 0  ;;  %s706_s0 = inlined_call_operand.hbm [shape: f32[16,128], index: 0, kind: input, shape index: {}]   ;;  %s707_s1 = inlined_call_operand.hbm [shape: f32[16,128], index: 1, kind: input, shape index: {}]   ;;  %s708_s2 = inlined_call_operand.hbm [shape: f32[16,128], index: 2, kind: input, shape index: {}]   ;;  %s709_s3 = inlined_call_operand.hbm [shape: f32[16,128], index: 3, kind: input, shape index: {}]   ;;  %s710_s4 = inlined_call_operand.hbm [shape: f32[1,8,128], index: 4, kind: output, shape index: {}]  }
   0x1   :  { %10 = vsyncpa [#allocation8], 0 }
   0x2   :  { %11 = vsyncpa [#allocation11], 0 }
   0x3   :  { %12 = vsyncpa [#allocation6], 0  ;;  %s541_s15 = smov [#allocation7]   ;;  %s542_s17 = smov [#allocation4]  }
   0x4   :  { %s42_s16 = sshll.u32 %s541_s15, 4  ;;  %s24_s18 = sshll.u32 %s542_s17, 4  ;;  %s43_s16 = int_to_ptr.vmem [resolvable:$true] %s42_s16  ;;  %s573_s18 = int_to_ptr.vmem [resolvable:$true] %s24_s18 }
   0x5   :  { %s423_s21 = scalar_lea.hbm %s707_s1, 256 }
   0x6   :  { %p424_p0 = scmp.ne.s32.totalorder %s707_s1, %s423_s21  ;;  %p427_p1 = scmp.lt.u32.totalorder %s423_s21, %s707_s1 }
   0x8   :  { %p429_p2 = pnand %p427_p1, %p424_p0 }
   0xa   :  { %432 = shalt.err (!%p429_p2)
}
   0xb   :  { %s433_s26 = scalar_lea.vmem %s43_s16, 256  ;;  %p438_p4 = scmp.lt.s32.totalorder %s43_s16, %s43_s16 }
   0xc   :  { %p434_p3 = scmp.ne.s32.totalorder %s43_s16, %s433_s26  ;;  %p439_p5 = scmp.lt.s32.totalorder %s433_s26, %s433_s26 }
   0xe   :  { %p440_p6 = por %p439_p5, %p438_p4 }
  0x10   :  { %p441_p7 = pnand %p440_p6, %p434_p3 }
  0x12   :  { %444 = shalt.err (!%p441_p7)
}
  0x13   :  { %s543_s27 = smov 128   ;;  %s544_s28 = smov 8  }
  0x14   :  { %48 = dma.hbm_to_vmem [thread:$0]  %s707_s1, 256, %s43_s16, [#allocation8], %s543_s27, %s543_s27, %s544_s28  }
  0x15   :  { %s445_s7 = scalar_lea.hbm %s706_s0, 256 }
  0x16   :  { %p446_p8 = scmp.ne.s32.totalorder %s706_s0, %s445_s7  ;;  %p449_p9 = scmp.lt.u32.totalorder %s445_s7, %s706_s0 }
  0x18   :  { %p451_p10 = pnand %p449_p9, %p446_p8 }
  0x1a   :  { %454 = shalt.err (!%p451_p10)
}
  0x1b   :  { %s455_s12 = scalar_lea.vmem %s573_s18, 256  ;;  %p460_p12 = scmp.lt.s32.totalorder %s573_s18, %s573_s18 }
  0x1c   :  { %p456_p11 = scmp.ne.s32.totalorder %s573_s18, %s455_s12  ;;  %p461_p13 = scmp.lt.s32.totalorder %s455_s12, %s455_s12 }
  0x1e   :  { %p462_p0 = por %p461_p13, %p460_p12 }
  0x20   :  { %p463_p1 = pnand %p462_p0, %p456_p11 }
  0x22   :  { %466 = shalt.err (!%p463_p1)
}
  0x23   :  { %30 = dma.hbm_to_vmem [thread:$0]  %s706_s0, 256, %s573_s18, [#allocation5], %s543_s27, %s543_s27, %s544_s28  }
  0x24   :  { %s545_s14 = smov [#allocation9]   ;;  %s546_s16 = smov [#allocation10]  }
  0x25   :  { %s60_s15 = sshll.u32 %s545_s14, 4  ;;  %s78_s17 = sshll.u32 %s546_s16, 4  ;;  %s61_s15 = int_to_ptr.vmem [resolvable:$true] %s60_s15  ;;  %s610_s17 = int_to_ptr.vmem [resolvable:$true] %s78_s17 }
  0x26   :  { %s467_s21 = scalar_lea.hbm %s708_s2, 256 }
  0x27   :  { %p468_p2 = scmp.ne.s32.totalorder %s708_s2, %s467_s21  ;;  %p471_p3 = scmp.lt.u32.totalorder %s467_s21, %s708_s2 }
  0x29   :  { %p473_p4 = pnand %p471_p3, %p468_p2 }
  0x2b   :  { %476 = shalt.err (!%p473_p4)
}
  0x2c   :  { %s477_s0 = scalar_lea.vmem %s61_s15, 256  ;;  %p482_p6 = scmp.lt.s32.totalorder %s61_s15, %s61_s15 }
  0x2d   :  { %p478_p5 = scmp.ne.s32.totalorder %s61_s15, %s477_s0  ;;  %p483_p7 = scmp.lt.s32.totalorder %s477_s0, %s477_s0 }
  0x2f   :  { %p484_p8 = por %p483_p7, %p482_p6 }
  0x31   :  { %p485_p9 = pnand %p484_p8, %p478_p5 }
  0x33   :  { %488 = shalt.err (!%p485_p9)
}
  0x34   :  { %66 = dma.hbm_to_vmem [thread:$0]  %s708_s2, 256, %s61_s15, [#allocation8], %s543_s27, %s543_s27, %s544_s28  }
  0x35   :  { %s489_s5 = scalar_lea.hbm %s709_s3, 256 }
  0x36   :  { %p490_p10 = scmp.ne.s32.totalorder %s709_s3, %s489_s5  ;;  %p493_p11 = scmp.lt.u32.totalorder %s489_s5, %s709_s3 }
  0x38   :  { %p495_p12 = pnand %p493_p11, %p490_p10 }
  0x3a   :  { %498 = shalt.err (!%p495_p12)
}
  0x3b   :  { %s499_s10 = scalar_lea.vmem %s610_s17, 256  ;;  %p504_p0 = scmp.lt.s32.totalorder %s610_s17, %s610_s17 }
  0x3c   :  { %p500_p13 = scmp.ne.s32.totalorder %s610_s17, %s499_s10  ;;  %p505_p1 = scmp.lt.s32.totalorder %s499_s10, %s499_s10 }
  0x3e   :  { %p506_p2 = por %p505_p1, %p504_p0 }
  0x40   :  { %p507_p3 = pnand %p506_p2, %p500_p13 }
  0x42   :  { %510 = shalt.err (!%p507_p3)
}
  0x43   :  { %84 = dma.hbm_to_vmem [thread:$0]  %s709_s3, 256, %s610_s17, [#allocation11], %s543_s27, %s543_s27, %s544_s28  }
  0x44   :  { %533 = dma.done.wait [#allocation5], 256  }
  0x45   :  { %534 = vsyncadd [#allocation5], 4294967040 }
  0x46   :  { %535 = dma.done.wait [#allocation8], 512  }
  0x47   :  { %536 = vsyncadd [#allocation8], 4294966784 }
  0x48   :  { %537 = dma.done.wait [#allocation11], 256  }
  0x49   :  { %538 = vsyncadd [#allocation11], 4294967040  ;;  %v194_v0 = vld [vmem:[#allocation4] sm:$0xff]  ;;  %v195_v1 = vld [vmem:[#allocation4 + $0x8] sm:$0xff]  ;;  %v180_v24 = vlaneseq  ;;  %s547_s3 = smov [#allocation12]  }
  0x4a   :  { %v196_v2 = vld [vmem:[#allocation7] sm:$0xff]  ;;  %v197_v3 = vld [vmem:[#allocation7 + $0x8] sm:$0xff]  ;;  %v316_v5 = vld [vmem:[#allocation9] sm:$0xff]  ;;  %s381_s27 = sshll.u32 %s547_s3, 4  ;;  %s382_s27 = int_to_ptr.vmem [resolvable:$true] %s381_s27 }
  0x4b   :  { %v647_v4 = vsub.f32 %v196_v2, %v194_v0  ;;  %v649_v6 = vsub.f32 %v197_v3, %v195_v1  ;;  %v317_v7 = vld [vmem:[#allocation9 + $0x8] sm:$0xff]  ;;  %v318_v8 = vld [vmem:[#allocation10] sm:$0xff]  ;;  %v319_v9 = vld [vmem:[#allocation10 + $0x8] sm:$0xff]  ;;  %v181_v29 = vshrl.u32 %v180_v24, 7  ;;  %v184_v36 = vand.u32 127, %v180_v24  ;;  %s511_s28 = scalar_lea.vmem %s382_s27, 128  ;;  %p516_p5 = scmp.lt.s32.totalorder %s382_s27, %s382_s27 }
  0x4c   :  { %v653_v13 = vsub.f32 %v316_v5, %v318_v8  ;;  %v655_v14 = vsub.f32 %v317_v7, %v319_v9  ;;  %p512_p4 = scmp.ne.s32.totalorder %s382_s27, %s511_s28  ;;  %p517_p6 = scmp.lt.s32.totalorder %s511_s28, %s511_s28 }
  0x4d   :  { %v206_v10 = vand.u32 2147483647, %v647_v4  ;;  %v207_v11 = vand.u32 2147483647, %v649_v6  ;;  %v182_v35 = vadd.s32 8, %v181_v29  ;;  %v185_v38 = vmul.u32 128, %v181_v29 }
  0x4e   :  { %v328_v18 = vand.u32 2147483647, %v653_v13  ;;  %v329_v19 = vand.u32 2147483647, %v655_v14  ;;  %v200_v47 = vmax.f32 %v647_v4, 0.0  ;;  %v201_v55 = vmax.f32 %v649_v6, 0.0  ;;  %p518_p7 = por %p517_p6, %p516_p5 }
  0x4f   :  { %v208_v12 = vsub.f32 0.0, %v206_v10  ;;  %v209_v15 = vsub.f32 0.0, %v207_v11  ;;  %v186_v45 = vmul.u32 128, %v182_v35  ;;  %v190_v46 = vadd.s32 %v185_v38, %v184_v36 }
  0x50   :  { %v330_v20 = vsub.f32 0.0, %v328_v18  ;;  %v331_v21 = vsub.f32 0.0, %v329_v19  ;;  %vm202_vm3 = vcmp.ne.f32.partialorder %v647_v4, %v647_v4  ;;  %vm203_vm4 = vcmp.ne.f32.partialorder %v649_v6, %v649_v6  ;;  %p519_p8 = pnand %p518_p7, %p512_p4 }
  0x51   :  { %v210_v16 = vmul.f32 1.442695, %v208_v12  ;;  %v212_v17 = vmul.f32 1.442695, %v209_v15  ;;  %v191_v61 = vadd.s32 %v186_v45, %v184_v36  ;;  %vm192_vm2 = vcmp.lt.s32.totalorder %v190_v46, 8 }
  0x52   :  { %v332_v22 = vmul.f32 1.442695, %v330_v20  ;;  %v334_v23 = vmul.f32 1.442695, %v331_v21  ;;  %v322_v5 = vmax.f32 %v653_v13, 0.0  ;;  %v323_v11 = vmax.f32 %v655_v14, 0.0 }
  0x53   :  { %407 = vpow2.f32 %v210_v16  ;;  %vm193_vm7 = vcmp.lt.s32.totalorder %v191_v61, 8  ;;  %vm324_vm8 = vcmp.ne.f32.partialorder %v653_v13, %v653_v13  ;;  %vm325_vm9 = vcmp.ne.f32.partialorder %v655_v14, %v655_v14 }
  0x54   :  { %409 = vpow2.f32 %v212_v17  ;;  %vm314_vm10 = vcmp.lt.s32.totalorder %v190_v46, 12  ;;  %vm315_vm11 = vcmp.lt.s32.totalorder %v191_v61, 12 }
  0x55   :  { %411 = vpow2.f32 %v332_v22 }
  0x56   :  { %413 = vpow2.f32 %v334_v23 }
  0x5d   :  { %v408_v25 = vpop.eup %407 }
  0x5e   :  { %v410_v26 = vpop.eup %409  ;;  %v214_v27 = vadd.f32 1.0, %v408_v25  ;;  %v217_v30 = vmul.f32 -0.5, %v408_v25  ;;  %v220_v40 = vand.u32 2147483647, %v408_v25 }
  0x5f   :  { %v223_v28 = vadd.f32 1.0, %v410_v26  ;;  %v412_v31 = vpop.eup %411  ;;  %v226_v32 = vmul.f32 -0.5, %v410_v26  ;;  %v229_v42 = vand.u32 2147483647, %v410_v26 }
  0x60   :  { %415 = vlog2.f32 %v214_v27  ;;  %v414_v33 = vpop.eup %413  ;;  %v336_v34 = vadd.f32 1.0, %v412_v31  ;;  %v218_v39 = vadd.f32 1.0, %v217_v30  ;;  %v339_v43 = vmul.f32 -0.5, %v412_v31 }
  0x61   :  { %417 = vlog2.f32 %v223_v28  ;;  %v345_v37 = vadd.f32 1.0, %v414_v33  ;;  %v227_v41 = vadd.f32 1.0, %v226_v32  ;;  %v348_v44 = vmul.f32 -0.5, %v414_v33 }
  0x62   :  { %419 = vlog2.f32 %v336_v34  ;;  %v219_v48 = vmul.f32 %v408_v25, %v218_v39  ;;  %vm660_vm0 = vcmp.lt.f32.partialorder %v220_v40, 0.0004427343  ;;  %vm664_vm1 = vcmp.lt.f32.partialorder %v229_v42, 0.0004427343 }
  0x63   :  { %421 = vlog2.f32 %v345_v37  ;;  %v228_v51 = vmul.f32 %v410_v26, %v227_v41  ;;  %v340_v53 = vadd.f32 1.0, %v339_v43  ;;  %v342_v57 = vand.u32 2147483647, %v412_v31 }
  0x64   :  { %v349_v58 = vadd.f32 1.0, %v348_v44  ;;  %v351_v60 = vand.u32 2147483647, %v414_v33 }
  0x65   :  { %v341_v1 = vmul.f32 %v412_v31, %v340_v53  ;;  %vm678_vm5 = vcmp.lt.f32.partialorder %v342_v57, 0.0004427343 }
  0x66   :  { %v350_v8 = vmul.f32 %v414_v33, %v349_v58  ;;  %vm352_vm6 = vcmp.lt.f32.partialorder %v351_v60, 0.0004427343 }
  0x6a   :  { %v416_v49 = vpop.eup %415 }
  0x6b   :  { %v418_v54 = vpop.eup %417  ;;  %v216_v56 = vmul.f32 0.6931472, %v416_v49 }
  0x6c   :  { %v225_v59 = vmul.f32 0.6931472, %v418_v54  ;;  %v420_v2 = vpop.eup %419 }
  0x6d   :  { %v222_v62 = vsel %vm660_vm0, %v219_v48, %v216_v56  ;;  %v422_v9 = vpop.eup %421  ;;  %v338_v12 = vmul.f32 0.6931472, %v420_v2 }
  0x6e   :  { %v231_v63 = vsel %vm664_vm1, %v228_v51, %v225_v59  ;;  %v232_v0 = vadd.f32 %v222_v62, %v200_v47  ;;  %v347_v17 = vmul.f32 0.6931472, %v422_v9 }
  0x6f   :  { %v233_v3 = vadd.f32 %v231_v63, %v201_v55  ;;  %v344_v19 = vsel %vm678_vm5, %v341_v1, %v338_v12 }
  0x70   :  { %v234_v10 = vsel %vm202_vm3, %v647_v4, %v232_v0  ;;  %v353_v4 = vsel %vm352_vm6, %v350_v8, %v347_v17  ;;  %v354_v21 = vadd.f32 %v344_v19, %v322_v5 }
  0x71   :  { %v235_v15 = vsel %vm203_vm4, %v649_v6, %v233_v3  ;;  %v236_v16 = vmul.f32 -1.0, %v234_v10  ;;  %v355_v23 = vadd.f32 %v353_v4, %v323_v11 }
  0x72   :  { %v237_v18 = vmul.f32 -1.0, %v235_v15  ;;  %v356_v6 = vsel %vm324_vm8, %v653_v13, %v354_v21 }
  0x73   :  { %v238_v20 = vsel %vm192_vm2, %v236_v16, 0.0  ;;  %v357_v25 = vsel %vm325_vm9, %v655_v14, %v355_v23  ;;  %v358_v26 = vmul.f32 -1.0, %v356_v6 }
  0x74   :  { %v239_v22 = vsel %vm193_vm7, %v237_v18, 0.0  ;;  %v359_v27 = vmul.f32 -1.0, %v357_v25 }
  0x75   :  { %v241_v24 = vadd.f32 %v239_v22, %v238_v20  ;;  %v360_v28 = vsel %vm314_vm10, %v358_v26, 0.0 }
  0x76   :  { %v361_v29 = vsel %vm315_vm11, %v359_v27, 0.0 }
  0x77   :  { %v363_v30 = vadd.f32 %v361_v29, %v360_v28  ;;  %v370_v31 = vmul.f32 -0.125, %v241_v24 }
  0x79   :  { %v372_v32 = vmul.f32 -0.083333336, %v363_v30 }
  0x7b   :  { %v373_v33 = vadd.f32 %v372_v32, %v370_v31 }
  0x7d   :  { %374 = vst [vmem:[#allocation12] sm:$0xff] %v373_v33 }
  0x7e   :  { %522 = shalt.err (!%p519_p8)
}
  0x7f   :  { %s523_s13 = scalar_lea.hbm %s710_s4, 128 }
  0x80   :  { %p524_p9 = scmp.ne.s32.totalorder %s710_s4, %s523_s13  ;;  %p527_p10 = scmp.lt.u32.totalorder %s523_s13, %s710_s4 }
  0x82   :  { %p529_p11 = pnand %p527_p10, %p524_p9 }
  0x84   :  { %532 = shalt.err (!%p529_p11)
}
  0x85   :  { %384 = dma.vmem_to_hbm [thread:$0]  %s382_s27, 128, %s710_s4, [#allocation6]  }
  0x86   :  { %539 = dma.done.wait [#allocation6], 128  }
  0x87   :  { %540 = vsyncadd [#allocation6], 4294967168 }
  0x88   :  { %388 = vsyncpa [#allocation5], 1 }
  0x89   :  { %389 = vsyncpa [#allocation8], 1 }
  0x8a   :  { %390 = vsyncpa [#allocation11], 1 }
  0x8b   :  { %391 = vsyncpa [#allocation6], 1 }

</bundles_post_ra>
